<compile_context>
chip_gen: v7x
topology: tpu7x:2x2x1
jax: 0.10.0
libtpu: 0.0.40
codegen_flags: <defaults>
</compile_context>

<pallas_src>
import functools

import jax
import jax.numpy as jnp
from jax.experimental import pallas as pl
from jax.experimental.pallas import tpu as pltpu

_LANES = 128  # lane width of a vreg


def _mlp_kernel(p_ref, x_ref, o_ref, *, hidden):
    # p_ref (SMEM, f32[3H+1]): [w1(H) | b1(H) | w2(H) | b2]
    # x_ref / o_ref (VMEM): (tr, 128) tiles, batch elements packed densely.
    x = x_ref[...]                                  # (tr, 128)
    acc = jnp.zeros_like(x)
    for j in range(hidden):                         # H = 10, statically unrolled
        w1j = p_ref[j]
        b1j = p_ref[hidden + j]
        w2j = p_ref[2 * hidden + j]
        acc = acc + w2j * jnp.tanh(x * w1j + b1j)   # VPU + EUP only
    o_ref[...] = acc + p_ref[3 * hidden]            # + b2, lane-dense store


def neural_net_forward(x, w1, b1, w2, b2, *, block_rows=512):
    """x: (B, 1) f32; w1: (1, H); b1: (H,); w2: (H, 1); b2: (1,) -> (B, 1)."""
    B, I = x.shape
    assert I == 1, "kernel specializes the module default in_features=1"
    H = w1.shape[1]
    assert w2.shape == (H, 1) and b1.shape == (H,) and b2.shape == (1,)

    # Pack all parameters into one flat f32 SMEM array (single tiny operand).
    p = jnp.concatenate(
        [w1.reshape(H), b1.reshape(H), w2.reshape(H), b2.reshape(1)]
    ).astype(jnp.float32)                            # (3H + 1,)

    # Flatten the batch onto a (rows, 128) lane-dense layout.
    rows = pl.cdiv(B, _LANES)
    tr = max(8, min(block_rows, ((rows + 7) // 8) * 8))   # sublane-aligned tile
    rows_p = pl.cdiv(rows, tr) * tr
    Bp = rows_p * _LANES

    xf = x.reshape(B).astype(jnp.float32)
    if Bp != B:
        xf = jnp.pad(xf, (0, Bp - B))
    x2 = xf.reshape(rows_p, _LANES)

    out2 = pl.pallas_call(
        functools.partial(_mlp_kernel, hidden=H),
        out_shape=jax.ShapeDtypeStruct((rows_p, _LANES), jnp.float32),
        grid=(rows_p // tr,),
        in_specs=[
            pl.BlockSpec(memory_space=pltpu.MemorySpace.SMEM),   # params (whole)
            pl.BlockSpec((tr, _LANES), lambda i: (i, 0)),        # x tiles
        ],
        out_specs=pl.BlockSpec((tr, _LANES), lambda i: (i, 0)),  # lane-dense out
        compiler_params=pltpu.CompilerParams(
            dimension_semantics=("parallel",)),
    )(p, x2)

    return out2.reshape(Bp, 1)[:B]


def reference_forward(x, w1, b1, w2, b2):
    h = jnp.tanh(x @ w1 + b1)
    return h @ w2 + b2


if __name__ == "__main__":
    # Module defaults: input_neuron_count=1, hidden_neuron_count=10, output_neuron_count=1
    IN, HID, OUT = 1, 10, 1
    BATCH = 8

    key = jax.random.PRNGKey(0)
    kx, kw1, kb1, kw2, kb2, kc = jax.random.split(key, 6)

    # PyTorch Linear init: U(-1/sqrt(fan_in), 1/sqrt(fan_in)); weights stored
    # here pre-transposed to (in_features, out_features).
    lim1 = 1.0 / jnp.sqrt(jnp.float32(IN))
    lim2 = 1.0 / jnp.sqrt(jnp.float32(HID))
    w1 = jax.random.uniform(kw1, (IN, HID), jnp.float32, -lim1, lim1)   # layer1.weight.T
    b1 = jax.random.uniform(kb1, (HID,), jnp.float32, -lim1, lim1)      # layer1.bias
    w2 = jax.random.uniform(kw2, (HID, OUT), jnp.float32, -lim2, lim2)  # layer2.weight.T
    b2 = jax.random.uniform(kb2, (OUT,), jnp.float32, -lim2, lim2)      # layer2.bias
    # self.C = nn.Parameter(torch.rand(1)) — not used in forward; kept for parity.
    C = jax.random.uniform(kc, (1,), jnp.float32)

    x = jax.random.uniform(kx, (BATCH, IN), jnp.float32, 0.0, 10.0)

    out = neural_net_forward(x, w1, b1, w2, b2)
    out = jax.block_until_ready(out)

    ref = reference_forward(x, w1, b1, w2, b2)
    assert out.shape == (BATCH, OUT)
    assert jnp.allclose(out, ref, atol=1e-5, rtol=1e-5), (out, ref)

    # TODO(synk): physics loss L(), compute_ux (jacobian), getC/clampC are
    # training-time utilities, not part of forward(); omitted from the kernel.
    print("KERNEL_OK")
</pallas_src>

<mosaic_0001>
module attributes {stable_mosaic.version = 11 : i64} {
  func.func @_mlp_kernel(%arg0: i32, %arg1: memref<31xf32, #tpu.memory_space<smem>>, %arg2: memref<8x128xf32, #tpu.memory_space<vmem>>, %arg3: memref<8x128xf32, #tpu.memory_space<vmem>>) attributes {dimension_semantics = [#tpu.dimension_semantics<parallel>], iteration_bounds = array<i64: 1>, scalar_prefetch = 0 : i64, scratch_operands = 0 : i64, tpu.core_type = #tpu.core_type<tc>, window_params = [{transform_indices = @transform_0, window_bounds = array<i64: 31>}, {transform_indices = @transform_1, window_bounds = array<i64: 8, 128>}, {transform_indices = @transform_2, window_bounds = array<i64: 8, 128>}]} {
    %c0 = arith.constant 0 : index
    %c0_0 = arith.constant 0 : index
    %0 = vector.load %arg2[%c0, %c0_0] : memref<8x128xf32, #tpu.memory_space<vmem>>, vector<8x128xf32>
    %cst = arith.constant 0.000000e+00 : f32
    %1 = vector.broadcast %cst : f32 to vector<8x128xf32>
    %c0_1 = arith.constant 0 : index
    %2 = memref.load %arg1[%c0_1] : memref<31xf32, #tpu.memory_space<smem>>
    %c10 = arith.constant 10 : index
    %3 = memref.load %arg1[%c10] : memref<31xf32, #tpu.memory_space<smem>>
    %c20 = arith.constant 20 : index
    %4 = memref.load %arg1[%c20] : memref<31xf32, #tpu.memory_space<smem>>
    %5 = vector.broadcast %2 : f32 to vector<8x128xf32>
    %6 = arith.mulf %0, %5 : vector<8x128xf32>
    %7 = vector.broadcast %3 : f32 to vector<8x128xf32>
    %8 = arith.addf %6, %7 : vector<8x128xf32>
    %9 = math.tanh %8 : vector<8x128xf32>
    %10 = vector.broadcast %4 : f32 to vector<8x128xf32>
    %11 = arith.mulf %10, %9 : vector<8x128xf32>
    %12 = arith.addf %1, %11 : vector<8x128xf32>
    %c1 = arith.constant 1 : index
    %13 = memref.load %arg1[%c1] : memref<31xf32, #tpu.memory_space<smem>>
    %c11 = arith.constant 11 : index
    %14 = memref.load %arg1[%c11] : memref<31xf32, #tpu.memory_space<smem>>
    %c21 = arith.constant 21 : index
    %15 = memref.load %arg1[%c21] : memref<31xf32, #tpu.memory_space<smem>>
    %16 = vector.broadcast %13 : f32 to vector<8x128xf32>
    %17 = arith.mulf %0, %16 : vector<8x128xf32>
    %18 = vector.broadcast %14 : f32 to vector<8x128xf32>
    %19 = arith.addf %17, %18 : vector<8x128xf32>
    %20 = math.tanh %19 : vector<8x128xf32>
    %21 = vector.broadcast %15 : f32 to vector<8x128xf32>
    %22 = arith.mulf %21, %20 : vector<8x128xf32>
    %23 = arith.addf %12, %22 : vector<8x128xf32>
    %c2 = arith.constant 2 : index
    %24 = memref.load %arg1[%c2] : memref<31xf32, #tpu.memory_space<smem>>
    %c12 = arith.constant 12 : index
    %25 = memref.load %arg1[%c12] : memref<31xf32, #tpu.memory_space<smem>>
    %c22 = arith.constant 22 : index
    %26 = memref.load %arg1[%c22] : memref<31xf32, #tpu.memory_space<smem>>
    %27 = vector.broadcast %24 : f32 to vector<8x128xf32>
    %28 = arith.mulf %0, %27 : vector<8x128xf32>
    %29 = vector.broadcast %25 : f32 to vector<8x128xf32>
    %30 = arith.addf %28, %29 : vector<8x128xf32>
    %31 = math.tanh %30 : vector<8x128xf32>
    %32 = vector.broadcast %26 : f32 to vector<8x128xf32>
    %33 = arith.mulf %32, %31 : vector<8x128xf32>
    %34 = arith.addf %23, %33 : vector<8x128xf32>
    %c3 = arith.constant 3 : index
    %35 = memref.load %arg1[%c3] : memref<31xf32, #tpu.memory_space<smem>>
    %c13 = arith.constant 13 : index
    %36 = memref.load %arg1[%c13] : memref<31xf32, #tpu.memory_space<smem>>
    %c23 = arith.constant 23 : index
    %37 = memref.load %arg1[%c23] : memref<31xf32, #tpu.memory_space<smem>>
    %38 = vector.broadcast %35 : f32 to vector<8x128xf32>
    %39 = arith.mulf %0, %38 : vector<8x128xf32>
    %40 = vector.broadcast %36 : f32 to vector<8x128xf32>
    %41 = arith.addf %39, %40 : vector<8x128xf32>
    %42 = math.tanh %41 : vector<8x128xf32>
    %43 = vector.broadcast %37 : f32 to vector<8x128xf32>
    %44 = arith.mulf %43, %42 : vector<8x128xf32>
    %45 = arith.addf %34, %44 : vector<8x128xf32>
    %c4 = arith.constant 4 : index
    %46 = memref.load %arg1[%c4] : memref<31xf32, #tpu.memory_space<smem>>
    %c14 = arith.constant 14 : index
    %47 = memref.load %arg1[%c14] : memref<31xf32, #tpu.memory_space<smem>>
    %c24 = arith.constant 24 : index
    %48 = memref.load %arg1[%c24] : memref<31xf32, #tpu.memory_space<smem>>
    %49 = vector.broadcast %46 : f32 to vector<8x128xf32>
    %50 = arith.mulf %0, %49 : vector<8x128xf32>
    %51 = vector.broadcast %47 : f32 to vector<8x128xf32>
    %52 = arith.addf %50, %51 : vector<8x128xf32>
    %53 = math.tanh %52 : vector<8x128xf32>
    %54 = vector.broadcast %48 : f32 to vector<8x128xf32>
    %55 = arith.mulf %54, %53 : vector<8x128xf32>
    %56 = arith.addf %45, %55 : vector<8x128xf32>
    %c5 = arith.constant 5 : index
    %57 = memref.load %arg1[%c5] : memref<31xf32, #tpu.memory_space<smem>>
    %c15 = arith.constant 15 : index
    %58 = memref.load %arg1[%c15] : memref<31xf32, #tpu.memory_space<smem>>
    %c25 = arith.constant 25 : index
    %59 = memref.load %arg1[%c25] : memref<31xf32, #tpu.memory_space<smem>>
    %60 = vector.broadcast %57 : f32 to vector<8x128xf32>
    %61 = arith.mulf %0, %60 : vector<8x128xf32>
    %62 = vector.broadcast %58 : f32 to vector<8x128xf32>
    %63 = arith.addf %61, %62 : vector<8x128xf32>
    %64 = math.tanh %63 : vector<8x128xf32>
    %65 = vector.broadcast %59 : f32 to vector<8x128xf32>
    %66 = arith.mulf %65, %64 : vector<8x128xf32>
    %67 = arith.addf %56, %66 : vector<8x128xf32>
    %c6 = arith.constant 6 : index
    %68 = memref.load %arg1[%c6] : memref<31xf32, #tpu.memory_space<smem>>
    %c16 = arith.constant 16 : index
    %69 = memref.load %arg1[%c16] : memref<31xf32, #tpu.memory_space<smem>>
    %c26 = arith.constant 26 : index
    %70 = memref.load %arg1[%c26] : memref<31xf32, #tpu.memory_space<smem>>
    %71 = vector.broadcast %68 : f32 to vector<8x128xf32>
    %72 = arith.mulf %0, %71 : vector<8x128xf32>
    %73 = vector.broadcast %69 : f32 to vector<8x128xf32>
    %74 = arith.addf %72, %73 : vector<8x128xf32>
    %75 = math.tanh %74 : vector<8x128xf32>
    %76 = vector.broadcast %70 : f32 to vector<8x128xf32>
    %77 = arith.mulf %76, %75 : vector<8x128xf32>
    %78 = arith.addf %67, %77 : vector<8x128xf32>
    %c7 = arith.constant 7 : index
    %79 = memref.load %arg1[%c7] : memref<31xf32, #tpu.memory_space<smem>>
    %c17 = arith.constant 17 : index
    %80 = memref.load %arg1[%c17] : memref<31xf32, #tpu.memory_space<smem>>
    %c27 = arith.constant 27 : index
    %81 = memref.load %arg1[%c27] : memref<31xf32, #tpu.memory_space<smem>>
    %82 = vector.broadcast %79 : f32 to vector<8x128xf32>
    %83 = arith.mulf %0, %82 : vector<8x128xf32>
    %84 = vector.broadcast %80 : f32 to vector<8x128xf32>
    %85 = arith.addf %83, %84 : vector<8x128xf32>
    %86 = math.tanh %85 : vector<8x128xf32>
    %87 = vector.broadcast %81 : f32 to vector<8x128xf32>
    %88 = arith.mulf %87, %86 : vector<8x128xf32>
    %89 = arith.addf %78, %88 : vector<8x128xf32>
    %c8 = arith.constant 8 : index
    %90 = memref.load %arg1[%c8] : memref<31xf32, #tpu.memory_space<smem>>
    %c18 = arith.constant 18 : index
    %91 = memref.load %arg1[%c18] : memref<31xf32, #tpu.memory_space<smem>>
    %c28 = arith.constant 28 : index
    %92 = memref.load %arg1[%c28] : memref<31xf32, #tpu.memory_space<smem>>
    %93 = vector.broadcast %90 : f32 to vector<8x128xf32>
    %94 = arith.mulf %0, %93 : vector<8x128xf32>
    %95 = vector.broadcast %91 : f32 to vector<8x128xf32>
    %96 = arith.addf %94, %95 : vector<8x128xf32>
    %97 = math.tanh %96 : vector<8x128xf32>
    %98 = vector.broadcast %92 : f32 to vector<8x128xf32>
    %99 = arith.mulf %98, %97 : vector<8x128xf32>
    %100 = arith.addf %89, %99 : vector<8x128xf32>
    %c9 = arith.constant 9 : index
    %101 = memref.load %arg1[%c9] : memref<31xf32, #tpu.memory_space<smem>>
    %c19 = arith.constant 19 : index
    %102 = memref.load %arg1[%c19] : memref<31xf32, #tpu.memory_space<smem>>
    %c29 = arith.constant 29 : index
    %103 = memref.load %arg1[%c29] : memref<31xf32, #tpu.memory_space<smem>>
    %104 = vector.broadcast %101 : f32 to vector<8x128xf32>
    %105 = arith.mulf %0, %104 : vector<8x128xf32>
    %106 = vector.broadcast %102 : f32 to vector<8x128xf32>
    %107 = arith.addf %105, %106 : vector<8x128xf32>
    %108 = math.tanh %107 : vector<8x128xf32>
    %109 = vector.broadcast %103 : f32 to vector<8x128xf32>
    %110 = arith.mulf %109, %108 : vector<8x128xf32>
    %111 = arith.addf %100, %110 : vector<8x128xf32>
    %c30 = arith.constant 30 : index
    %112 = memref.load %arg1[%c30] : memref<31xf32, #tpu.memory_space<smem>>
    %113 = vector.broadcast %112 : f32 to vector<8x128xf32>
    %114 = arith.addf %111, %113 : vector<8x128xf32>
    %c0_2 = arith.constant 0 : index
    %c0_3 = arith.constant 0 : index
    %115 = vector.load %arg3[%c0_2, %c0_3] : memref<8x128xf32, #tpu.memory_space<vmem>>, vector<8x128xf32>
    tpu.vector_store %arg3[%c0_2, %c0_3], %114 {strides = array<i32>} : memref<8x128xf32, #tpu.memory_space<vmem>>, vector<8x128xf32>,
    return
  }
  func.func @transform_0(%arg0: i32) -> i32 {
    %c0_i32 = arith.constant 0 : i32
    %c0_i32_0 = arith.constant 0 : i32
    return %c0_i32 : i32
  }
  func.func @transform_1(%arg0: i32) -> (i32, i32) {
    %c0_i32 = arith.constant 0 : i32
    %c0_i32_0 = arith.constant 0 : i32
    return %arg0, %c0_i32 : i32, i32
  }
  func.func @transform_2(%arg0: i32) -> (i32, i32) {
    %c0_i32 = arith.constant 0 : i32
    %c0_i32_0 = arith.constant 0 : i32
    return %arg0, %c0_i32 : i32, i32
  }
}

</mosaic_0001>

<bundles_post_ra>
// kernel: tpu_custom_call.1
= control target key start
LH: loop header
LB: loop body
LE: loop exit
PB: predicated region body
PF: predicated region fallthrough
CT: control target
= control target key end

     0   :  { %7 = vsyncpa [#allocation5], 0  ;;  %s399_s0 = inlined_call_operand.hbm [shape: f32[31], index: 0, kind: input, shape index: {}]   ;;  %s400_s1 = inlined_call_operand.hbm [shape: f32[8,128], index: 1, kind: input, shape index: {}]   ;;  %s401_s2 = inlined_call_operand.hbm [shape: f32[8,128], index: 2, kind: output, shape index: {}]  }
   0x1   :  { %8 = vsyncpa [#allocation3], 0 }
   0x2   :  { %9 = vsyncpa [#allocation4], 0  ;;  %s219_s11 = scalar_lea.hbm %s399_s0, 16 }
   0x3   :  { %p220_p0 = scmp.ne.s32.totalorder %s399_s0, %s219_s11  ;;  %p223_p1 = scmp.lt.u32.totalorder %s219_s11, %s399_s0 }
   0x5   :  { %p225_p2 = pnand %p223_p1, %p220_p0 }
   0x7   :  { %228 = shalt.err (!%p225_p2)
}
   0x8   :  { %s279_s16 = smov [#allocation2]   ;;  %s280_s19 = smov [#allocation6]  }
   0x9   :  { %17 = dma.hbm_to_smem %s399_s0, 16, %s279_s16, [#allocation5]  }
   0xa   :  { %s24_s20 = sshll.u32 %s280_s19, 4  ;;  %s229_s23 = scalar_lea.hbm %s400_s1, 128  ;;  %s25_s20 = int_to_ptr.vmem [resolvable:$true] %s24_s20 }
   0xb   :  { %p230_p3 = scmp.ne.s32.totalorder %s400_s1, %s229_s23  ;;  %p233_p4 = scmp.lt.u32.totalorder %s229_s23, %s400_s1 }
   0xd   :  { %p235_p5 = pnand %p233_p4, %p230_p3 }
   0xf   :  { %238 = shalt.err (!%p235_p5)
}
  0x10   :  { %s239_s28 = scalar_lea.vmem %s25_s20, 128  ;;  %p244_p7 = scmp.lt.s32.totalorder %s25_s20, %s25_s20 }
  0x11   :  { %p240_p6 = scmp.ne.s32.totalorder %s25_s20, %s239_s28  ;;  %p245_p8 = scmp.lt.s32.totalorder %s239_s28, %s239_s28 }
  0x13   :  { %p246_p9 = por %p245_p8, %p244_p7 }
  0x15   :  { %p247_p10 = pnand %p246_p9, %p240_p6 }
  0x17   :  { %250 = shalt.err (!%p247_p10)
}
  0x18   :  { %27 = dma.hbm_to_vmem [thread:$0]  %s400_s1, 128, %s25_s20, [#allocation3]  }
  0x19   :  { %273 = dma.done.wait [#allocation5], 16  }
  0x1a   :  { %274 = vsyncadd [#allocation5], 4294967280 }
  0x1b   :  { %275 = dma.done.wait [#allocation3], 128  }
  0x1c   :  { %276 = vsyncadd [#allocation3], 4294967168 }
  0x1d   :  { %34 = sfence }
  0x1e   :  { %s36_s30 = sld [smem:[#allocation2]]  ;;  %s166_s3 = sld [smem:[#allocation2 + $0xa]]  ;;  %v321_v0 = vld [vmem:[#allocation6] sm:$0xff] }
  0x1f   :  { %s168_s4 = sld [smem:[#allocation2 + $0x1]]  ;;  %s169_s5 = sld [smem:[#allocation2 + $0xb]] }
  0x20   :  { %s171_s6 = sld [smem:[#allocation2 + $0x2]]  ;;  %s172_s7 = sld [smem:[#allocation2 + $0xc]] }
  0x21   :  { %s174_s8 = sld [smem:[#allocation2 + $0x3]]  ;;  %s323_s9 = sld [smem:[#allocation2 + $0xd]] }
  0x22   :  { %s177_s10 = sld [smem:[#allocation2 + $0x4]]  ;;  %s325_s1 = sld [smem:[#allocation2 + $0xe]] }
  0x23   :  { %s328_s11 = sld [smem:[#allocation2 + $0x5]]  ;;  %s331_s12 = sld [smem:[#allocation2 + $0xf]] }
  0x24   :  { %v39_v1 = vstv %s36_s30  ;;  %v41_v2 = vstv %s166_s3  ;;  %s333_s13 = sld [smem:[#allocation2 + $0x6]]  ;;  %s335_s14 = sld [smem:[#allocation2 + $0x10]] }
  0x25   :  { %v40_v3 = vmul.f32 %v39_v1, %v321_v0  ;;  %v50_v4 = vstv %s168_s4  ;;  %v52_v6 = vstv %s169_s5  ;;  %s337_s15 = sld [smem:[#allocation2 + $0x14]]  ;;  %s340_s16 = sld [smem:[#allocation2 + $0x7]] }
  0x26   :  { %v51_v5 = vmul.f32 %v50_v4, %v321_v0  ;;  %v61_v8 = vstv %s171_s6  ;;  %v63_v9 = vstv %s172_s7  ;;  %s342_s17 = sld [smem:[#allocation2 + $0x15]]  ;;  %s346_s18 = sld [smem:[#allocation2 + $0x11]] }
  0x27   :  { %v42_v7 = vadd.f32 %v41_v2, %v40_v3  ;;  %v62_v11 = vmul.f32 %v61_v8, %v321_v0  ;;  %v72_v12 = vstv %s174_s8  ;;  %v74_v14 = vstv %s323_s9  ;;  %s189_s19 = sld [smem:[#allocation2 + $0x8]]  ;;  %s349_s20 = sld [smem:[#allocation2 + $0x12]] }
  0x28   :  { %v53_v10 = vadd.f32 %v52_v6, %v51_v5  ;;  %v73_v13 = vmul.f32 %v72_v12, %v321_v0  ;;  %v83_v16 = vstv %s177_s10  ;;  %v85_v17 = vstv %s325_s1  ;;  %s192_s21 = sld [smem:[#allocation2 + $0x9]]  ;;  %s353_s22 = sld [smem:[#allocation2 + $0x16]] }
  0x29   :  { %199 = vtanh.f32 %v42_v7  ;;  %v64_v15 = vadd.f32 %v63_v9, %v62_v11  ;;  %v84_v19 = vmul.f32 %v83_v16, %v321_v0  ;;  %v94_v20 = vstv %s328_s11  ;;  %s357_s23 = sld [smem:[#allocation2 + $0x13]]  ;;  %s359_s24 = sld [smem:[#allocation2 + $0x17]] }
  0x2a   :  { %201 = vtanh.f32 %v53_v10  ;;  %v75_v18 = vadd.f32 %v74_v14, %v73_v13  ;;  %v95_v21 = vmul.f32 %v94_v20, %v321_v0  ;;  %v96_v22 = vstv %s331_s12  ;;  %s365_s25 = sld [smem:[#allocation2 + $0x18]]  ;;  %s369_s26 = sld [smem:[#allocation2 + $0x19]] }
  0x2b   :  { %203 = vtanh.f32 %v64_v15  ;;  %v86_v23 = vadd.f32 %v85_v17, %v84_v19  ;;  %v105_v24 = vstv %s333_s13  ;;  %v107_v25 = vstv %s335_s14  ;;  %s375_s27 = sld [smem:[#allocation2 + $0x1a]]  ;;  %s380_s28 = sld [smem:[#allocation2 + $0x1b]] }
  0x2c   :  { %205 = vtanh.f32 %v75_v18  ;;  %v97_v26 = vadd.f32 %v96_v22, %v95_v21  ;;  %v106_v27 = vmul.f32 %v105_v24, %v321_v0  ;;  %v116_v28 = vstv %s340_s16  ;;  %s191_s0 = sld [smem:[#allocation2 + $0x1c]]  ;;  %s194_s29 = sld [smem:[#allocation2 + $0x1d]] }
  0x2d   :  { %207 = vtanh.f32 %v86_v23  ;;  %v117_v29 = vmul.f32 %v116_v28, %v321_v0  ;;  %v118_v30 = vstv %s346_s18  ;;  %v127_v32 = vstv %s189_s19  ;;  %s195_s30 = sld [smem:[#allocation2 + $0x1e]]  ;;  %s281_s3 = smov [#allocation7]  }
  0x2e   :  { %209 = vtanh.f32 %v97_v26  ;;  %v108_v31 = vadd.f32 %v107_v25, %v106_v27  ;;  %v129_v33 = vstv %s349_s20  ;;  %v44_v34 = vstv %s337_s15  ;;  %s156_s4 = sshll.u32 %s281_s3, 4  ;;  %s157_s4 = int_to_ptr.vmem [resolvable:$true] %s156_s4 }
  0x2f   :  { %v119_v35 = vadd.f32 %v118_v30, %v117_v29  ;;  %v128_v36 = vmul.f32 %v127_v32, %v321_v0  ;;  %v138_v37 = vstv %s192_s21  ;;  %v55_v38 = vstv %s342_s17  ;;  %s251_s5 = scalar_lea.vmem %s157_s4, 128  ;;  %p256_p12 = scmp.lt.s32.totalorder %s157_s4, %s157_s4 }
  0x30   :  { %211 = vtanh.f32 %v108_v31  ;;  %v139_v39 = vmul.f32 %v138_v37, %v321_v0  ;;  %v140_v40 = vstv %s357_s23  ;;  %v66_v45 = vstv %s353_s22  ;;  %p252_p11 = scmp.ne.s32.totalorder %s157_s4, %s251_s5  ;;  %p257_p13 = scmp.lt.s32.totalorder %s251_s5, %s251_s5 }
  0x31   :  { %213 = vtanh.f32 %v119_v35  ;;  %v130_v42 = vadd.f32 %v129_v33, %v128_v36  ;;  %v77_v48 = vstv %s359_s24  ;;  %v88_v53 = vstv %s365_s25 }
  0x32   :  { %v141_v46 = vadd.f32 %v140_v40, %v139_v39  ;;  %v99_v55 = vstv %s369_s26  ;;  %v110_v60 = vstv %s375_s27  ;;  %v121_v0 = vstv %s380_s28  ;;  %p258_p0 = por %p257_p13, %p256_p12 }
  0x33   :  { %v200_v41 = vpop.eup %199  ;;  %215 = vtanh.f32 %v130_v42  ;;  %v132_v4 = vstv %s191_s0  ;;  %v143_v9 = vstv %s194_s29  ;;  %v147_v15 = vstv %s195_s30 }
  0x34   :  { %v202_v43 = vpop.eup %201  ;;  %v45_v44 = vmul.f32 %v200_v41, %v44_v34  ;;  %217 = vtanh.f32 %v141_v46  ;;  %p259_p1 = pnand %p258_p0, %p252_p11 }
  0x35   :  { %v56_v47 = vmul.f32 %v202_v43, %v55_v38  ;;  %v204_v49 = vpop.eup %203 }
  0x36   :  { %v206_v50 = vpop.eup %205  ;;  %v67_v52 = vmul.f32 %v204_v49, %v66_v45 }
  0x37   :  { %v57_v51 = vadd.f32 %v56_v47, %v45_v44  ;;  %v78_v54 = vmul.f32 %v206_v50, %v77_v48  ;;  %v208_v56 = vpop.eup %207 }
  0x38   :  { %v210_v58 = vpop.eup %209  ;;  %v89_v59 = vmul.f32 %v208_v56, %v88_v53 }
  0x39   :  { %v68_v57 = vadd.f32 %v67_v52, %v57_v51  ;;  %v100_v62 = vmul.f32 %v210_v58, %v99_v55 }
  0x3a   :  { %v212_v63 = vpop.eup %211 }
  0x3b   :  { %v79_v61 = vadd.f32 %v78_v54, %v68_v57  ;;  %v214_v1 = vpop.eup %213  ;;  %v111_v3 = vmul.f32 %v212_v63, %v110_v60 }
  0x3c   :  { %v122_v7 = vmul.f32 %v214_v1, %v121_v0 }
  0x3d   :  { %v90_v2 = vadd.f32 %v89_v59, %v79_v61  ;;  %v216_v5 = vpop.eup %215 }
  0x3e   :  { %v218_v8 = vpop.eup %217  ;;  %v133_v11 = vmul.f32 %v216_v5, %v132_v4 }
  0x3f   :  { %v101_v6 = vadd.f32 %v100_v62, %v90_v2  ;;  %v144_v13 = vmul.f32 %v218_v8, %v143_v9 }
  0x41   :  { %v112_v10 = vadd.f32 %v111_v3, %v101_v6 }
  0x43   :  { %v123_v12 = vadd.f32 %v122_v7, %v112_v10 }
  0x45   :  { %v134_v14 = vadd.f32 %v133_v11, %v123_v12 }
  0x47   :  { %v145_v16 = vadd.f32 %v144_v13, %v134_v14 }
  0x49   :  { %v148_v17 = vadd.f32 %v147_v15, %v145_v16 }
  0x4b   :  { %149 = vst [vmem:[#allocation7] sm:$0xff] %v148_v17 }
  0x4c   :  { %262 = shalt.err (!%p259_p1)
}
  0x4d   :  { %s263_s8 = scalar_lea.hbm %s401_s2, 128 }
  0x4e   :  { %p264_p2 = scmp.ne.s32.totalorder %s401_s2, %s263_s8  ;;  %p267_p3 = scmp.lt.u32.totalorder %s263_s8, %s401_s2 }
  0x50   :  { %p269_p4 = pnand %p267_p3, %p264_p2 }
  0x52   :  { %272 = shalt.err (!%p269_p4)
}
  0x53   :  { %159 = dma.vmem_to_hbm [thread:$0]  %s157_s4, 128, %s401_s2, [#allocation4]  }
  0x54   :  { %277 = dma.done.wait [#allocation4], 128  }
  0x55   :  { %278 = vsyncadd [#allocation4], 4294967168 }
  0x56   :  { %163 = vsyncpa [#allocation3], 1 }
  0x57   :  { %164 = vsyncpa [#allocation4], 1 }
  0x58   :  { %165 = vsyncpa [#allocation5], 1 }

</bundles_post_ra>
